<compile_context>
chip_gen: v6e
topology: v6e:2x2x1
jax: 0.10.0
libtpu: 0.0.40
codegen_flags: <defaults>
</compile_context>

<pallas_src>
import jax
import jax.numpy as jnp
from jax.experimental import pallas as pl
from jax.experimental.pallas import tpu as pltpu

USE_ELU = False  # matches the PyTorch module's global


def _activation(x):
    return jax.nn.elu(x) if USE_ELU else jnp.tanh(x)


# Contract lhs dim 1 with rhs dim 1 (i.e. A @ B^T) -- same dimension numbers the
# official TPU flash-attention kernel uses for q @ k^T, so this lowering is safe.
_TRANS_B_DIMS = (((1,), (1,)), ((), ()))


def critic_kernel(x_ref, w1_ref, b1_ref, w2_ref, b2_ref, wv8_ref, bv_ref, o_ref):
    """One batch-tile of the fused Critic forward.

    x_ref:   (tile_b, s_dim)  VMEM   (tiled over grid axis 0)
    w1_ref:  (s_dim, h1)      VMEM   (resident: constant index_map)
    b1_ref:  (1, h1)          VMEM
    w2_ref:  (h1, h2p)        VMEM   (h2 zero-padded to a lane multiple)
    b2_ref:  (1, h2p)         VMEM
    wv8_ref: (8, h2p)         VMEM   v_std-folded head weights, 8 identical rows
    bv_ref:  (1,)             SMEM   scalar: v_std*bv + v_mean, pre-folded
    o_ref:   (1, tile_b)      VMEM   lane-dense value row for this tile
    """
    x = x_ref[...]

    # hidden layer 1 (MXU matmul + VPU bias + EUP tanh)
    h = jnp.dot(x, w1_ref[...], preferred_element_type=jnp.float32) + b1_ref[...]
    h = _activation(h)

    # hidden layer 2
    h = jnp.dot(h, w2_ref[...], preferred_element_type=jnp.float32) + b2_ref[...]
    h = _activation(h)

    # Value head (N=1): contract h2 against the replicated-row head weights so
    # the result is produced batch-on-lanes: (8, tile_b), rows identical.
    # This gives an unmasked, lane-dense (1, tile_b) store instead of a
    # (tile_b, 1) column written through 1/128-dense masked vst.
    v = jax.lax.dot_general(wv8_ref[...], h, _TRANS_B_DIMS,
                            preferred_element_type=jnp.float32)
    o_ref[...] = (v[0:1, :] + bv_ref[0]).astype(o_ref.dtype)


_MAX_TILE_B = 1024   # rows per grid step (sweep 512-1024; per-step VMEM stays tiny)
_MIN_TILE_B = 256


def _pick_tile_b(B):
    """Return (tile_b, num_tiles, B_pad).

    Small B -> one grid step, no padding.  Large B -> a 128-multiple tile that
    divides B exactly (avoids an extra HBM read+write of x just to pad it),
    preferring an even number of tiles so both TensorCores get work on v7x via
    dimension_semantics=("parallel",).  Only if no such divisor exists do we
    fall back to padding x.
    """
    if B <= _MAX_TILE_B:
        return B, 1, B
    best = None
    for t in range(_MAX_TILE_B, _MIN_TILE_B - 1, -128):
        if B % t == 0:
            n = B // t
            if n % 2 == 0:          # even tile count: v7x megacore friendly
                return t, n, B
            if best is None:
                best = (t, n, B)
    if best is not None:
        return best
    t = 512                          # ragged fallback: pad (rare; costs one extra pass over x)
    n = pl.cdiv(B, t)
    return t, n, n * t


@jax.jit
def critic_forward(x, w1, b1, w2, b2, wv8, bv_fold):
    B, s_dim = x.shape
    tile_b, num_tiles, B_pad = _pick_tile_b(B)
    if B_pad != B:
        x = jnp.pad(x, ((0, B_pad - B), (0, 0)))

    def resident(arr):
        # Full-array block with constant index_map: DMA'd once, stays in VMEM.
        # (Hygiene option: pipeline_mode=pl.Buffered(1) would drop the unused
        #  second buffer of these constant blocks.)
        return pl.BlockSpec(arr.shape, lambda i: (0, 0))

    grid_spec = pltpu.PrefetchScalarGridSpec(
        num_scalar_prefetch=0,
        grid=(num_tiles,),
        in_specs=[
            pl.BlockSpec((tile_b, s_dim), lambda i: (i, 0)),    # x: tiled on rows
            resident(w1),
            resident(b1),
            resident(w2),
            resident(b2),
            resident(wv8),
            pl.BlockSpec(memory_space=pltpu.MemorySpace.SMEM),  # folded head bias
        ],
        out_specs=pl.BlockSpec((1, tile_b), lambda i: (0, i)),  # lane-dense value row
    )

    out_row = pl.pallas_call(
        critic_kernel,
        out_shape=jax.ShapeDtypeStruct((1, B_pad), jnp.float32),
        grid_spec=grid_spec,
        compiler_params=pltpu.CompilerParams(
            dimension_semantics=("parallel",)),
    )(x, w1, b1, w2, b2, wv8, bv_fold)

    # (1, B_pad) -> (B, 1): contiguous, free reshape in the wrapper.
    return out_row[0, :B].reshape(B, 1)


def _pad_last_to(a, mult=128):
    pad = (-a.shape[-1]) % mult
    if pad == 0:
        return a
    widths = [(0, 0)] * (a.ndim - 1) + [(0, pad)]
    return jnp.pad(a, widths)


def fold_params(p):
    """Fold v_std/v_mean into the value head and pad h2 to lane width.

    Returns (w1, b1, w2, b2, wv8, bv_fold) ready for critic_forward.
    Exact numerics: padded columns produce tanh(0)=0 (elu(0)=0) and are
    multiplied by zero head weights; the head rows are replicated 8x only to
    keep the MXU M-dim at a full sublane (row 0 is what gets stored).
    """
    v_std = p["v_std"][0]
    v_mean = p["v_mean"][0]
    wv_row = _pad_last_to((v_std * p["wv"]).reshape(1, -1))            # (1, h2p)
    wv8 = jnp.tile(wv_row, (8, 1))                                      # (8, h2p)
    bv_fold = jnp.reshape(v_std * p["bv"][0, 0] + v_mean, (1,))         # (1,)
    w2 = _pad_last_to(p["w2"])
    b2 = _pad_last_to(p["b2"])
    return p["w1"], p["b1"], w2, b2, wv8, bv_fold


def make_params(key, s_dim, hidden, val_min, val_max):
    """Deterministic orthogonal init (gain=1) + zero biases, like the module."""
    ortho = jax.nn.initializers.orthogonal(scale=1.0)
    dims = [s_dim] + list(hidden)
    keys = jax.random.split(key, len(hidden) + 1)

    params = {}
    for i, (din, dout) in enumerate(zip(dims[:-1], dims[1:])):
        # PyTorch weight is (out, in); orthogonalize that then transpose to (in, out)
        w = ortho(keys[i], (dout, din), jnp.float32).T
        params[f"w{i + 1}"] = w
        params[f"b{i + 1}"] = jnp.zeros((1, dout), jnp.float32)
    wv = ortho(keys[-1], (1, dims[-1]), jnp.float32).T                  # (h2, 1)
    params["wv"] = wv
    params["bv"] = jnp.zeros((1, 1), jnp.float32)
    # non-trainable de-normalization constants
    params["v_mean"] = jnp.array([(val_max + val_min) / 2.0], jnp.float32)
    params["v_std"] = jnp.array([(val_max - val_min) / 2.0], jnp.float32)
    return params


def reference_forward(x, p):
    h = _activation(x @ p["w1"] + p["b1"])
    h = _activation(h @ p["w2"] + p["b2"])
    v = h @ p["wv"] + p["bv"]
    return p["v_std"][0] * v + p["v_mean"][0]


if __name__ == "__main__":
    # Shapes consistent with the module (kept small): s_dim=32, hidden=[128, 64].
    # Two batch sizes: B=64 exercises the single-tile / no-padding path,
    # B=2048 exercises the multi-tile path (2 x 1024 rows, even tile count).
    S_DIM = 32
    HIDDEN = [128, 64]
    VAL_MIN, VAL_MAX = -10.0, 10.0

    key = jax.random.PRNGKey(0)
    k_x, k_p = jax.random.split(key)
    p = make_params(k_p, S_DIM, HIDDEN, VAL_MIN, VAL_MAX)
    folded = fold_params(p)

    for B in (64, 2048):
        x = jax.random.normal(jax.random.fold_in(k_x, B), (B, S_DIM), jnp.float32)
        out = jax.block_until_ready(critic_forward(x, *folded))
        ref = reference_forward(x, p)
        assert out.shape == (B, 1)
        assert jnp.allclose(out, ref, atol=1e-4, rtol=1e-4), (
            B, float(jnp.max(jnp.abs(out - ref))))

    print("KERNEL_OK")
</pallas_src>

<mosaic_0001>
module attributes {stable_mosaic.version = 11 : i64} {
  func.func @critic_kernel(%arg0: i32, %arg1: memref<64x32xf32, #tpu.memory_space<vmem>>, %arg2: memref<32x128xf32, #tpu.memory_space<vmem>>, %arg3: memref<1x128xf32, #tpu.memory_space<vmem>>, %arg4: memref<128x128xf32, #tpu.memory_space<vmem>>, %arg5: memref<1x128xf32, #tpu.memory_space<vmem>>, %arg6: memref<8x128xf32, #tpu.memory_space<vmem>>, %arg7: memref<1xf32, #tpu.memory_space<smem>>, %arg8: memref<1x64xf32, #tpu.memory_space<vmem>>) attributes {dimension_semantics = [#tpu.dimension_semantics<parallel>], iteration_bounds = array<i64: 1>, scalar_prefetch = 0 : i64, scratch_operands = 0 : i64, tpu.core_type = #tpu.core_type<tc>, window_params = [{transform_indices = @transform_0, window_bounds = array<i64: 64, 32>}, {pipeline_mode = #tpu.pipeline_mode<synchronous>, transform_indices = @transform_1, window_bounds = array<i64: 32, 128>}, {pipeline_mode = #tpu.pipeline_mode<synchronous>, transform_indices = @transform_2, window_bounds = array<i64: 1, 128>}, {pipeline_mode = #tpu.pipeline_mode<synchronous>, transform_indices = @transform_3, window_bounds = array<i64: 128, 128>}, {pipeline_mode = #tpu.pipeline_mode<synchronous>, transform_indices = @transform_4, window_bounds = array<i64: 1, 128>}, {pipeline_mode = #tpu.pipeline_mode<synchronous>, transform_indices = @transform_5, window_bounds = array<i64: 8, 128>}, {transform_indices = @transform_6, window_bounds = array<i64: 1>}, {transform_indices = @transform_7, window_bounds = array<i64: 1, 64>}]} {
    %c0 = arith.constant 0 : index
    %c0_0 = arith.constant 0 : index
    %0 = vector.load %arg1[%c0, %c0_0] : memref<64x32xf32, #tpu.memory_space<vmem>>, vector<64x32xf32>
    %c0_1 = arith.constant 0 : index
    %c0_2 = arith.constant 0 : index
    %1 = vector.load %arg2[%c0_1, %c0_2] : memref<32x128xf32, #tpu.memory_space<vmem>>, vector<32x128xf32>
    %cst = arith.constant dense<0.000000e+00> : vector<64x128xf32>
    %2 = tpu.matmul %0, %1, %cst {dimension_numbers = #tpu.dot_dimension_numbers<[1], [0], [0], [1], [0, 0, 1, 1], [], []>} : vector<64x32xf32>, vector<32x128xf32>, vector<64x128xf32> -> vector<64x128xf32>
    %c0_3 = arith.constant 0 : index
    %c0_4 = arith.constant 0 : index
    %3 = vector.load %arg3[%c0_3, %c0_4] : memref<1x128xf32, #tpu.memory_space<vmem>>, vector<1x128xf32>
    %4 = vector.broadcast %3 : vector<1x128xf32> to vector<64x128xf32>
    %5 = arith.addf %2, %4 : vector<64x128xf32>
    %6 = math.tanh %5 : vector<64x128xf32>
    %c0_5 = arith.constant 0 : index
    %c0_6 = arith.constant 0 : index
    %7 = vector.load %arg4[%c0_5, %c0_6] : memref<128x128xf32, #tpu.memory_space<vmem>>, vector<128x128xf32>
    %cst_7 = arith.constant dense<0.000000e+00> : vector<64x128xf32>
    %8 = tpu.matmul %6, %7, %cst_7 {dimension_numbers = #tpu.dot_dimension_numbers<[1], [0], [0], [1], [0, 0, 1, 1], [], []>} : vector<64x128xf32>, vector<128x128xf32>, vector<64x128xf32> -> vector<64x128xf32>
    %c0_8 = arith.constant 0 : index
    %c0_9 = arith.constant 0 : index
    %9 = vector.load %arg5[%c0_8, %c0_9] : memref<1x128xf32, #tpu.memory_space<vmem>>, vector<1x128xf32>
    %10 = vector.broadcast %9 : vector<1x128xf32> to vector<64x128xf32>
    %11 = arith.addf %8, %10 : vector<64x128xf32>
    %12 = math.tanh %11 : vector<64x128xf32>
    %c0_10 = arith.constant 0 : index
    %c0_11 = arith.constant 0 : index
    %13 = vector.load %arg6[%c0_10, %c0_11] : memref<8x128xf32, #tpu.memory_space<vmem>>, vector<8x128xf32>
    %cst_12 = arith.constant dense<0.000000e+00> : vector<8x64xf32>
    %14 = tpu.matmul %13, %12, %cst_12 {dimension_numbers = #tpu.dot_dimension_numbers<[1], [1], [0], [0], [0, 0, 1, 0], [], []>} : vector<8x128xf32>, vector<64x128xf32>, vector<8x64xf32> -> vector<8x64xf32>
    %15 = vector.extract_strided_slice %14 {offsets = [0, 0], sizes = [1, 64], strides = [1, 1]} : vector<8x64xf32> to vector<1x64xf32>
    %c0_13 = arith.constant 0 : index
    %16 = memref.load %arg7[%c0_13] : memref<1xf32, #tpu.memory_space<smem>>
    %17 = vector.broadcast %16 : f32 to vector<1x64xf32>
    %18 = arith.addf %15, %17 : vector<1x64xf32>
    %c0_14 = arith.constant 0 : index
    %c0_15 = arith.constant 0 : index
    %19 = vector.load %arg8[%c0_14, %c0_15] : memref<1x64xf32, #tpu.memory_space<vmem>>, vector<1x64xf32>
    tpu.vector_store %arg8[%c0_14, %c0_15], %18 {strides = array<i32>} : memref<1x64xf32, #tpu.memory_space<vmem>>, vector<1x64xf32>,
    return
  }
  func.func @transform_0(%arg0: i32) -> (i32, i32) {
    %c0_i32 = arith.constant 0 : i32
    %c0_i32_0 = arith.constant 0 : i32
    return %arg0, %c0_i32 : i32, i32
  }
  func.func @transform_1(%arg0: i32) -> (i32, i32) {
    %c0_i32 = arith.constant 0 : i32
    %c0_i32_0 = arith.constant 0 : i32
    %c0_i32_1 = arith.constant 0 : i32
    return %c0_i32, %c0_i32_0 : i32, i32
  }
  func.func @transform_2(%arg0: i32) -> (i32, i32) {
    %c0_i32 = arith.constant 0 : i32
    %c0_i32_0 = arith.constant 0 : i32
    %c0_i32_1 = arith.constant 0 : i32
    return %c0_i32, %c0_i32_0 : i32, i32
  }
  func.func @transform_3(%arg0: i32) -> (i32, i32) {
    %c0_i32 = arith.constant 0 : i32
    %c0_i32_0 = arith.constant 0 : i32
    %c0_i32_1 = arith.constant 0 : i32
    return %c0_i32, %c0_i32_0 : i32, i32
  }
  func.func @transform_4(%arg0: i32) -> (i32, i32) {
    %c0_i32 = arith.constant 0 : i32
    %c0_i32_0 = arith.constant 0 : i32
    %c0_i32_1 = arith.constant 0 : i32
    return %c0_i32, %c0_i32_0 : i32, i32
  }
  func.func @transform_5(%arg0: i32) -> (i32, i32) {
    %c0_i32 = arith.constant 0 : i32
    %c0_i32_0 = arith.constant 0 : i32
    %c0_i32_1 = arith.constant 0 : i32
    return %c0_i32, %c0_i32_0 : i32, i32
  }
  func.func @transform_6(%arg0: i32) -> i32 {
    %c0_i32 = arith.constant 0 : i32
    %c0_i32_0 = arith.constant 0 : i32
    return %c0_i32 : i32
  }
  func.func @transform_7(%arg0: i32) -> (i32, i32) {
    %c0_i32 = arith.constant 0 : i32
    %c0_i32_0 = arith.constant 0 : i32
    return %c0_i32, %arg0 : i32, i32
  }
}

</mosaic_0001>

<bundles_post_ra>
// kernel: critic_forward.1
= control target key start
LH: loop header
LB: loop body
LE: loop exit
PB: predicated region body
PF: predicated region fallthrough
CT: control target
= control target key end

     0   :  { %13 = vsyncpa [#allocation4], 0  ;;  %s754_s0 = inlined_call_operand.vmem [shape: f32[64,32], index: 0, kind: input, shape index: {}]   ;;  %s755_s1 = inlined_call_operand.vmem [shape: f32[32,128], index: 1, kind: input, shape index: {}]   ;;  %s756_s2 = inlined_call_operand.vmem [shape: f32[1,128], index: 2, kind: input, shape index: {}]   ;;  %s757_s3 = inlined_call_operand.hbm [shape: f32[128,128], index: 3, kind: input, shape index: {}]   ;;  %s758_s4 = inlined_call_operand.vmem [shape: f32[1,128], index: 4, kind: input, shape index: {}]   ;;  %s759_s5 = inlined_call_operand.vmem [shape: f32[8,128], index: 5, kind: input, shape index: {}]   ;;  %s760_s6 = inlined_call_operand.<no memory space> [shape: f32[1], index: 6, kind: input, shape index: {}]   ;;  %s761_s7 = inlined_call_operand.hbm [shape: f32[1,64], index: 7, kind: output, shape index: {}]  }
   0x1   :  { %14 = vsyncpa [#allocation5], 0  ;;  %s646_s24 = smov [#allocation3]  }
   0x2   :  { %s26_s25 = sshll.u32 %s646_s24, 4  ;;  %s27_s25 = int_to_ptr.vmem [resolvable:$true] %s26_s25 }
   0x3   :  { %s610_s26 = scalar_lea.vmem %s27_s25, 2048  ;;  %p615_p1 = scmp.lt.s32.totalorder %s27_s25, %s27_s25 }
   0x4   :  { %p611_p0 = scmp.ne.s32.totalorder %s27_s25, %s610_s26  ;;  %p616_p2 = scmp.lt.s32.totalorder %s610_s26, %s610_s26 }
   0x6   :  { %p617_p3 = por %p616_p2, %p615_p1 }
   0x8   :  { %p618_p4 = pnand %p617_p3, %p611_p0 }
   0xa   :  { %621 = shalt.err (!%p618_p4)
}
   0xb   :  { %s647_s27 = smov 128   ;;  %s648_s28 = smov 8  }
   0xc   :  { %32 = dma.hbm_to_vmem [thread:$0]  %s757_s3, 2048, %s27_s25, [#allocation4], %s647_s27, %s647_s27, %s648_s28  }
   0xd   :  { %642 = dma.done.wait [#allocation4], 2048  }
   0xe   :  { %643 = vsyncadd [#allocation4], 4294965248  ;;  %vm61_vm0 = vcmask 261120   ;;  %v53_v0 = vld [vmem:[%s755_s1 + $0x18] sm:$0xff]  ;;  %v52_v1 = vld [vmem:[%s755_s1 + $0x10] sm:$0xff]  ;;  %v649_v53 = vmov 0.0  }
   0xf   :  { %481 = vmatprep.subr.mxu0 %v53_v0  ;;  %v42_v2 = vld [vmem:[%s754_s0] sm:$0xff]  ;;  %v51_v3 = vld [vmem:[%s755_s1 + $0x8] sm:$0xff]  ;;  %v214_v5 = vld [vmem:[#allocation3 + $0x78] sm:$0xff]  ;;  %vm650_vm1 = vmmov 0   ;;  %s651_s12 = smov [#allocation6]   ;;  %vm409_vm2 = vcmask 516096  }
  0x10   :  { %482 = vmatpush3.msra.mxu0 %v53_v0  ;;  %489 = vmatprep.mubr.msk.f32.mxu0 %vm61_vm0, %v42_v2  ;;  %v50_v4 = vld [vmem:[%s755_s1] sm:$0xff]  ;;  %v213_v6 = vld [vmem:[#allocation3 + $0x70] sm:$0xff]  ;;  %v43_v7 = vld [vmem:[%s754_s0 + $0x8] sm:$0xff]  ;;  %s417_s13 = sshll.u32 %s651_s12, 4  ;;  %s418_s13 = int_to_ptr.vmem [resolvable:$true] %s417_s13 }
  0x11   :  { %483 = vmatprep.subr.mxu0 %v52_v1  ;;  %501 = vmatprep.subr.mxu1 %v214_v5  ;;  %v212_v8 = vld [vmem:[#allocation3 + $0x68] sm:$0xff]  ;;  %v44_v9 = vld [vmem:[%s754_s0 + $0x10] sm:$0xff]  ;;  %v211_v10 = vld [vmem:[#allocation3 + $0x60] sm:$0xff]  ;;  %s622_s14 = scalar_lea.vmem %s418_s13, 16  ;;  %s626_s15 = scalar_lea.vmem %s418_s13, 32 }
  0x12   :  { %484 = vmatpush3.msra.mxu0 %v52_v1  ;;  %502 = vmatpush3.msra.mxu1 %v214_v5  ;;  %v45_v11 = vld [vmem:[%s754_s0 + $0x18] sm:$0xff]  ;;  %v46_v13 = vld [vmem:[%s754_s0 + $0x20] sm:$0xff]  ;;  %v209_v14 = vld [vmem:[#allocation3 + $0x50] sm:$0xff]  ;;  %p623_p5 = scmp.ne.s32.totalorder %s418_s13, %s622_s14  ;;  %p627_p6 = scmp.lt.s32.totalorder %s418_s13, %s418_s13 }
  0x13   :  { %485 = vmatprep.subr.mxu0 %v51_v3  ;;  %503 = vmatprep.subr.mxu1 %v213_v6  ;;  %v210_v12 = vld [vmem:[#allocation3 + $0x58] sm:$0xff]  ;;  %v47_v15 = vld [vmem:[%s754_s0 + $0x28] sm:$0xff]  ;;  %v48_v16 = vld [vmem:[%s754_s0 + $0x30] sm:$0xff]  ;;  %p628_p7 = scmp.lt.s32.totalorder %s626_s15, %s622_s14 }
  0x14   :  { %486 = vmatpush3.msra.mxu0 %v51_v3  ;;  %504 = vmatpush3.msra.mxu1 %v213_v6  ;;  %v49_v17 = vld [vmem:[%s754_s0 + $0x38] sm:$0xff]  ;;  %v208_v18 = vld [vmem:[#allocation3 + $0x48] sm:$0xff]  ;;  %v207_v19 = vld [vmem:[#allocation3 + $0x40] sm:$0xff] }
  0x15   :  { %487 = vmatprep.subr.mxu0 %v50_v4  ;;  %505 = vmatprep.subr.mxu1 %v212_v8  ;;  %v206_v20 = vld [vmem:[#allocation3 + $0x38] sm:$0xff]  ;;  %v205_v21 = vld [vmem:[#allocation3 + $0x30] sm:$0xff]  ;;  %v204_v22 = vld [vmem:[#allocation3 + $0x28] sm:$0xff]  ;;  %p629_p8 = por %p628_p7, %p627_p6 }
  0x16   :  { %488 = vmatpush3.msra.mxu0 %v50_v4  ;;  %506 = vmatpush3.msra.mxu1 %v212_v8  ;;  %v203_v23 = vld [vmem:[#allocation3 + $0x20] sm:$0xff]  ;;  %v202_v24 = vld [vmem:[#allocation3 + $0x18] sm:$0xff]  ;;  %v201_v25 = vld [vmem:[#allocation3 + $0x10] sm:$0xff] }
  0x17   :  { %490 = vmatmul.mubr.msk.f32.vlgmr.msra.gmra.mxu0 %vm61_vm0, %v43_v7  ;;  %507 = vmatprep.subr.mxu1 %v211_v10  ;;  %v200_v26 = vld [vmem:[#allocation3 + $0x8] sm:$0xff]  ;;  %v199_v27 = vld [vmem:[#allocation3] sm:$0xff]  ;;  %p630_p9 = pnand %p629_p8, %p623_p5 }
  0x18   :  { %492 = vmatprep.mubr.msk.f32.mxu0 %vm61_vm0, %v44_v9  ;;  %508 = vmatpush3.msra.mxu1 %v211_v10  ;;  %v426_v28 = vld [vmem:[%s756_s2] ss:$0 sm:$0xff] }
  0x19   :  { %509 = vmatprep.subr.mxu1 %v210_v12  ;;  %545 = vmatprep.subr.mxu0 %v649_v53  ;;  %v435_v60 = vld [vmem:[%s758_s4] ss:$0 sm:$0xff] }
  0x1a   :  { %510 = vmatpush3.msra.mxu1 %v210_v12 }
  0x1b   :  { %493 = vmatmul.mubr.msk.f32.gmra.mxu0 %vm61_vm0, %v45_v11  ;;  %511 = vmatprep.subr.mxu1 %v209_v14 }
  0x1c   :  { %495 = vmatprep.mubr.msk.f32.mxu0 %vm61_vm0, %v46_v13  ;;  %512 = vmatpush3.msra.mxu1 %v209_v14 }
  0x1d   :  { %513 = vmatprep.subr.mxu1 %v208_v18 }
  0x1e   :  { %514 = vmatpush3.msra.mxu1 %v208_v18 }
  0x1f   :  { %496 = vmatmul.mubr.msk.f32.gmra.mxu0 %vm61_vm0, %v47_v15  ;;  %515 = vmatprep.subr.mxu1 %v207_v19  ;;  %v335_v15 = vld [vmem:[%s759_s5] sm:$0xff] }
  0x20   :  { %498 = vmatprep.mubr.msk.f32.mxu0 %vm61_vm0, %v48_v16  ;;  %516 = vmatpush3.msra.mxu1 %v207_v19  ;;  %v407_v16 = vstv %s760_s6 }
  0x21   :  { %517 = vmatprep.subr.mxu1 %v206_v20 }
  0x22   :  { %518 = vmatpush3.msra.mxu1 %v206_v20 }
  0x23   :  { %499 = vmatmul.mubr.msk.f32.gmra.mxu0 %vm61_vm0, %v49_v17  ;;  %519 = vmatprep.subr.mxu1 %v205_v21 }
  0x24   :  { %520 = vmatpush3.msra.mxu1 %v205_v21  ;;  %561 = vmatprep.mubr.msk.f32.mxu0 %vm650_vm1, %v649_v53 }
  0x25   :  { %521 = vmatprep.subr.mxu1 %v204_v22 }
  0x26   :  { %522 = vmatpush3.msra.mxu1 %v204_v22 }
  0x27   :  { %523 = vmatprep.subr.mxu1 %v203_v23 }
  0x28   :  { %524 = vmatpush3.msra.mxu1 %v203_v23 }
  0x29   :  { %525 = vmatprep.subr.mxu1 %v202_v24 }
  0x2a   :  { %526 = vmatpush3.msra.mxu1 %v202_v24 }
  0x2b   :  { %527 = vmatprep.subr.mxu1 %v201_v25 }
  0x2c   :  { %528 = vmatpush3.msra.mxu1 %v201_v25 }
  0x2d   :  { %529 = vmatprep.subr.mxu1 %v200_v26 }
  0x2e   :  { %530 = vmatpush3.msra.mxu1 %v200_v26 }
  0x2f   :  { %531 = vmatprep.subr.mxu1 %v199_v27 }
  0x30   :  { %532 = vmatpush3.msra.mxu1 %v199_v27 }
  0xd7   :  { %v491_v29 = vpop.f32.mrf.mxu0 }
  0xd8   :  { %v158_v30 = vadd.f32 %v491_v29, %v426_v28 }
  0xd9   :  { %v152_v31 = vpop.f32.mrf.mxu0 }
  0xda   :  { %v153_v32 = vadd.f32 %v426_v28, %v152_v31 }
  0xdb   :  { %v494_v33 = vpop.f32.mrf.mxu0 }
  0xdc   :  { %570 = vtanh.f32 %v153_v32  ;;  %v168_v34 = vadd.f32 %v494_v33, %v426_v28 }
  0xdd   :  { %572 = vtanh.f32 %v158_v30  ;;  %v162_v35 = vpop.f32.mrf.mxu0 }
  0xde   :  { %v163_v36 = vadd.f32 %v426_v28, %v162_v35 }
  0xdf   :  { %v497_v37 = vpop.f32.mrf.mxu0 }
  0xe0   :  { %574 = vtanh.f32 %v163_v36  ;;  %v178_v38 = vadd.f32 %v497_v37, %v426_v28 }
  0xe1   :  { %576 = vtanh.f32 %v168_v34  ;;  %v172_v39 = vpop.f32.mrf.mxu0 }
  0xe2   :  { %v173_v40 = vadd.f32 %v426_v28, %v172_v39 }
  0xe3   :  { %v500_v41 = vpop.f32.mrf.mxu0 }
  0xe4   :  { %578 = vtanh.f32 %v173_v40  ;;  %v188_v42 = vadd.f32 %v500_v41, %v426_v28 }
  0xe5   :  { %580 = vtanh.f32 %v178_v38  ;;  %v182_v43 = vpop.f32.mrf.mxu0 }
  0xe6   :  { %v183_v44 = vadd.f32 %v426_v28, %v182_v43 }
  0xe8   :  { %582 = vtanh.f32 %v183_v44 }
  0xe9   :  { %v571_v45 = vpop.eup %570  ;;  %584 = vtanh.f32 %v188_v42 }
  0xea   :  { %v573_v46 = vpop.eup %572  ;;  %533 = vmatprep.mubr.f32.mxu1 %v571_v45 }
  0xeb   :  { %534 = vmatmul.mubr.f32.vlgmr.msra.gmra.mxu1 %v573_v46 }
  0xed   :  { %v575_v47 = vpop.eup %574 }
  0xee   :  { %v577_v48 = vpop.eup %576  ;;  %536 = vmatprep.mubr.f32.mxu1 %v575_v47 }
  0xef   :  { %537 = vmatmul.mubr.f32.gmra.mxu1 %v577_v48 }
  0xf1   :  { %v579_v49 = vpop.eup %578 }
  0xf2   :  { %v581_v50 = vpop.eup %580  ;;  %539 = vmatprep.mubr.f32.mxu1 %v579_v49 }
  0xf3   :  { %540 = vmatmul.mubr.f32.gmra.mxu1 %v581_v50 }
  0xf5   :  { %v583_v51 = vpop.eup %582 }
  0xf6   :  { %v585_v52 = vpop.eup %584  ;;  %542 = vmatprep.mubr.f32.mxu1 %v583_v51 }
  0xf7   :  { %543 = vmatmul.mubr.f32.gmra.mxu1 %v585_v52 }
 0x1ab   :  { %v535_v54 = vpop.f32.mrf.mxu1 }
 0x1ac   :  { %v294_v7 = vadd.f32 %v535_v54, %v435_v60 }
 0x1ad   :  { %v288_v55 = vpop.f32.mrf.mxu1 }
 0x1ae   :  { %v289_v9 = vadd.f32 %v435_v60, %v288_v55 }
 0x1af   :  { %v538_v56 = vpop.f32.mrf.mxu1 }
 0x1b0   :  { %v304_v3 = vadd.f32 %v538_v56, %v435_v60 }
 0x1b1   :  { %v298_v57 = vpop.f32.mrf.mxu1 }
 0x1b2   :  { %v299_v5 = vadd.f32 %v435_v60, %v298_v57 }
 0x1b3   :  { %v541_v58 = vpop.f32.mrf.mxu1 }
 0x1b4   :  { %v314_v1 = vadd.f32 %v541_v58, %v435_v60 }
 0x1b5   :  { %v308_v59 = vpop.f32.mrf.mxu1 }
 0x1b6   :  { %v309_v2 = vadd.f32 %v435_v60, %v308_v59 }
 0x1b7   :  { %v544_v61 = vpop.f32.mrf.mxu1 }
 0x1b8   :  { %v324_v62 = vadd.f32 %v544_v61, %v435_v60 }
 0x1b9   :  { %v318_v63 = vpop.f32.mrf.mxu1 }
 0x1ba   :  { %586 = vtanh.f32 %v324_v62  ;;  %v319_v0 = vadd.f32 %v435_v60, %v318_v63 }
 0x1bc   :  { %588 = vtanh.f32 %v319_v0 }
 0x1bd   :  { %590 = vtanh.f32 %v314_v1 }
 0x1be   :  { %592 = vtanh.f32 %v309_v2 }
 0x1bf   :  { %594 = vtanh.f32 %v304_v3 }
 0x1c0   :  { %596 = vtanh.f32 %v299_v5 }
 0x1c1   :  { %598 = vtanh.f32 %v294_v7 }
 0x1c2   :  { %600 = vtanh.f32 %v289_v9 }
 0x1c7   :  { %v587_v4 = vpop.eup %586 }
 0x1c8   :  { %546 = vmatpush3.xpose.msra.mxu0 %v587_v4 }
 0x1c9   :  { %547 = vmatprep.subr.mxu0 %v649_v53  ;;  %v589_v6 = vpop.eup %588 }
 0x1ca   :  { %v591_v8 = vpop.eup %590 }
 0x1cb   :  { %v593_v10 = vpop.eup %592 }
 0x1cc   :  { %548 = vmatpush3.xpose.msra.mxu0 %v589_v6  ;;  %v595_v11 = vpop.eup %594 }
 0x1cd   :  { %549 = vmatprep.subr.mxu0 %v649_v53  ;;  %v597_v12 = vpop.eup %596 }
 0x1ce   :  { %v599_v13 = vpop.eup %598 }
 0x1cf   :  { %v601_v14 = vpop.eup %600 }
 0x1d0   :  { %550 = vmatpush3.xpose.msra.mxu0 %v591_v8 }
 0x1d1   :  { %551 = vmatprep.subr.mxu0 %v649_v53 }
 0x1d4   :  { %552 = vmatpush3.xpose.msra.mxu0 %v593_v10 }
 0x1d5   :  { %553 = vmatprep.subr.mxu0 %v649_v53 }
 0x1d8   :  { %554 = vmatpush3.xpose.msra.mxu0 %v595_v11 }
 0x1d9   :  { %555 = vmatprep.subr.mxu0 %v649_v53 }
 0x1dc   :  { %556 = vmatpush3.xpose.msra.mxu0 %v597_v12 }
 0x1dd   :  { %557 = vmatprep.subr.mxu0 %v649_v53 }
 0x1e0   :  { %558 = vmatpush3.xpose.msra.mxu0 %v599_v13 }
 0x1e1   :  { %559 = vmatprep.subr.mxu0 %v649_v53 }
 0x1e4   :  { %560 = vmatpush3.xpose.msra.mxu0 %v601_v14 }
 0x1e7   :  { %562 = vmatmul.mubr.f32.vlgmr.msra.gmra.mxu0 %v335_v15 }
 0x2a7   :  { %v402_v17 = vpop.f32.mrf.mxu0 }
 0x2a8   :  { %v408_v18 = vadd.f32 %v407_v16, %v402_v17 }
 0x2a9   :  { %v563_v19 = vpop.f32.mrf.mxu0 }
 0x2aa   :  { %410 = vst.msk [vmem:[#allocation6] sm:$0x1] %vm409_vm2, %v408_v18 }
 0x2ab   :  { %633 = shalt.err (!%p630_p9)
}
 0x2ac   :  { %420 = dma.vmem_to_hbm [thread:$0]  %s418_s13, 16, %s761_s7, [#allocation5]  }
 0x2ad   :  { %644 = dma.done.wait [#allocation5], 16  }
 0x2ae   :  { %645 = vsyncadd [#allocation5], 4294967280 }
 0x2af   :  { %424 = vsyncpa [#allocation4], 1 }
 0x2b0   :  { %425 = vsyncpa [#allocation5], 1 }

</bundles_post_ra>
